<compile_context>
chip_gen: v6e
topology: v6e:2x2x1
jax: 0.10.0
libtpu: 0.0.40
codegen_flags: <defaults>
</compile_context>

<pallas_src>
import jax
import jax.numpy as jnp
from jax.experimental import pallas as pl
from jax.experimental.pallas import tpu as pltpu

_LANES = 128


def _bce_dice_partial_kernel(pred_ref, targ_ref,
                             bce_out, inter_out, psum_out, tsum_out,
                             bce_acc, inter_acc, psum_acc, tsum_acc):
    k = pl.program_id(1)

    # Initialize lane-wide accumulators at the start of each reduction sweep.
    @pl.when(k == 0)
    def _():
        bce_acc[...] = jnp.zeros_like(bce_acc)
        inter_acc[...] = jnp.zeros_like(inter_acc)
        psum_acc[...] = jnp.zeros_like(psum_acc)
        tsum_acc[...] = jnp.zeros_like(tsum_acc)

    p = pred_ref[...].astype(jnp.float32)     # (B, rows_tile, 128)
    t = targ_ref[...].astype(jnp.float32)

    # torch.nn.BCELoss semantics: -(t*log(p) + (1-t)*log(1-p)), logs clamped
    # at -100 (clamp before the multiply avoids 0 * -inf = nan).
    log_p = jnp.maximum(jnp.log(p), -100.0)
    log_1mp = jnp.maximum(jnp.log(1.0 - p), -100.0)
    bce_el = -(t * log_p + (1.0 - t) * log_1mp)

    # Reduce only the row (sublane) axis per step; keep lanes wide.  The
    # final cross-lane reduce happens once, outside the kernel, on tiny
    # arrays.
    bce_acc[...] += jnp.sum(bce_el, axis=1)    # (B, 128)
    inter_acc[...] += jnp.sum(p * t, axis=1)
    psum_acc[...] += jnp.sum(p, axis=1)
    tsum_acc[...] += jnp.sum(t, axis=1)

    # Write this split's partial sums on the last reduction step.
    @pl.when(k == pl.num_programs(1) - 1)
    def _():
        bce_out[...] = bce_acc[...][None]
        inter_out[...] = inter_acc[...][None]
        psum_out[...] = psum_acc[...][None]
        tsum_out[...] = tsum_acc[...][None]


def bce_dice_loss(pred, target, *, target_block_bytes=4 * 1024 * 1024):
    """pred, target: (B, C, H, W) float arrays with pred in (0, 1)."""
    B = pred.shape[0]
    p_flat = pred.reshape(B, -1).astype(jnp.float32)
    t_flat = target.reshape(B, -1).astype(jnp.float32)
    N = p_flat.shape[1]                        # real per-example element count

    # Sublane-dense layout: rows of 128 lanes.
    rows = -(-N // _LANES)
    # rows_tile: ~target_block_bytes per f32 input block, multiple of 8.
    rows_target = max(8, (target_block_bytes // (B * _LANES * 4)) // 8 * 8)
    rows_tile = min(rows_target, ((rows + 7) // 8) * 8)
    n_blocks = -(-rows // rows_tile)
    n_splits = 2 if n_blocks >= 2 else 1       # megacore split (helps v7x)
    rows_pad = -(-rows // (rows_tile * n_splits)) * (rows_tile * n_splits)
    blocks_per_split = rows_pad // (rows_tile * n_splits)

    pad = rows_pad * _LANES - N
    if pad:
        # Zero padding contributes exactly 0 to the BCE and Dice sums.
        p_flat = jnp.pad(p_flat, ((0, 0), (0, pad)))
        t_flat = jnp.pad(t_flat, ((0, 0), (0, pad)))
    p3 = p_flat.reshape(B, rows_pad, _LANES)
    t3 = t_flat.reshape(B, rows_pad, _LANES)

    def in_map(s, k):
        return (0, s * blocks_per_split + k, 0)

    part_shape = jax.ShapeDtypeStruct((n_splits, B, _LANES), jnp.float32)
    out_spec = pl.BlockSpec((1, B, _LANES), lambda s, k: (s, 0, 0))

    bce_p, inter_p, psum_p, tsum_p = pl.pallas_call(
        _bce_dice_partial_kernel,
        out_shape=(part_shape, part_shape, part_shape, part_shape),
        grid_spec=pltpu.PrefetchScalarGridSpec(
            num_scalar_prefetch=0,
            grid=(n_splits, blocks_per_split),
            in_specs=[
                pl.BlockSpec((B, rows_tile, _LANES), in_map),
                pl.BlockSpec((B, rows_tile, _LANES), in_map),
            ],
            out_specs=(out_spec, out_spec, out_spec, out_spec),
            scratch_shapes=[
                pltpu.VMEM((B, _LANES), jnp.float32),   # BCE partial sums
                pltpu.VMEM((B, _LANES), jnp.float32),   # intersection
                pltpu.VMEM((B, _LANES), jnp.float32),   # pred sum
                pltpu.VMEM((B, _LANES), jnp.float32),   # target sum
            ],
        ),
        compiler_params=pltpu.CompilerParams(
            dimension_semantics=("parallel", "arbitrary"),
            vmem_limit_bytes=32 * 1024 * 1024),
    )(p3, t3)

    # Tiny final combine (a few hundred floats) in plain JAX.
    smooth = 1.0
    bce = jnp.sum(bce_p) / (B * N)
    inter = jnp.sum(inter_p, axis=(0, 2))      # (B,)
    psum = jnp.sum(psum_p, axis=(0, 2))
    tsum = jnp.sum(tsum_p, axis=(0, 2))
    dice_score = (2.0 * inter + smooth) / (psum + tsum + smooth)
    dice_loss = 1.0 - jnp.mean(dice_score)
    return bce + dice_loss


def _reference(pred, target):
    # Pure-JAX reference matching the PyTorch module.
    B = pred.shape[0]
    p = pred.reshape(B, -1).astype(jnp.float32)
    t = target.reshape(B, -1).astype(jnp.float32)
    log_p = jnp.maximum(jnp.log(p), -100.0)
    log_1mp = jnp.maximum(jnp.log(1.0 - p), -100.0)
    bce = jnp.mean(-(t * log_p + (1.0 - t) * log_1mp))
    inter = jnp.sum(p * t, axis=1)
    dice_score = (2.0 * inter + 1.0) / (jnp.sum(p, axis=1) + jnp.sum(t, axis=1) + 1.0)
    dice_loss = 1.0 - jnp.mean(dice_score)
    return bce + dice_loss


if __name__ == "__main__":
    key = jax.random.PRNGKey(0)
    k1, k2 = jax.random.split(key)
    B, C, H, W = 2, 4, 16, 16
    # pred: probabilities in (0,1); target: binary mask.
    pred = jax.nn.sigmoid(jax.random.normal(k1, (B, C, H, W), dtype=jnp.float32))
    target = (jax.random.uniform(k2, (B, C, H, W)) > 0.5).astype(jnp.float32)

    loss = jax.block_until_ready(bce_dice_loss(pred, target))
    ref = jax.block_until_ready(_reference(pred, target))
    assert jnp.allclose(loss, ref, atol=1e-5, rtol=1e-5), (loss, ref)
    print("KERNEL_OK")
</pallas_src>

<mosaic_0001>
module attributes {stable_mosaic.version = 11 : i64} {
  func.func @_bce_dice_partial_kernel(%arg0: i32, %arg1: i32, %arg2: memref<2x8x128xf32, #tpu.memory_space<vmem>>, %arg3: memref<2x8x128xf32, #tpu.memory_space<vmem>>, %arg4: memref<1x2x128xf32, #tpu.memory_space<vmem>>, %arg5: memref<1x2x128xf32, #tpu.memory_space<vmem>>, %arg6: memref<1x2x128xf32, #tpu.memory_space<vmem>>, %arg7: memref<1x2x128xf32, #tpu.memory_space<vmem>>, %arg8: memref<2x128xf32, #tpu.memory_space<vmem>>, %arg9: memref<2x128xf32, #tpu.memory_space<vmem>>, %arg10: memref<2x128xf32, #tpu.memory_space<vmem>>, %arg11: memref<2x128xf32, #tpu.memory_space<vmem>>) attributes {dimension_semantics = [#tpu.dimension_semantics<parallel>, #tpu.dimension_semantics<arbitrary>], iteration_bounds = array<i64: 1, 1>, scalar_prefetch = 0 : i64, scratch_operands = 4 : i64, tpu.core_type = #tpu.core_type<tc>, window_params = [{transform_indices = @transform_0, window_bounds = array<i64: 2, 8, 128>}, {transform_indices = @transform_1, window_bounds = array<i64: 2, 8, 128>}, {transform_indices = @transform_2, window_bounds = array<i64: 1, 2, 128>}, {transform_indices = @transform_3, window_bounds = array<i64: 1, 2, 128>}, {transform_indices = @transform_4, window_bounds = array<i64: 1, 2, 128>}, {transform_indices = @transform_5, window_bounds = array<i64: 1, 2, 128>}]} {
    %c0_i32 = arith.constant 0 : i32
    %0 = arith.cmpi eq, %arg1, %c0_i32 : i32
    %1 = arith.extui %0 : i1 to i32
    %c0_i32_0 = arith.constant 0 : i32
    %2 = arith.cmpi ne, %1, %c0_i32_0 : i32
    scf.if %2 {
      %cst_32 = arith.constant 0.000000e+00 : f32
      %40 = vector.broadcast %cst_32 : f32 to vector<2x128xf32>
      %c0_33 = arith.constant 0 : index
      %c0_34 = arith.constant 0 : index
      %41 = vector.load %arg8[%c0_33, %c0_34] : memref<2x128xf32, #tpu.memory_space<vmem>>, vector<2x128xf32>
      tpu.vector_store %arg8[%c0_33, %c0_34], %40 {strides = array<i32>} : memref<2x128xf32, #tpu.memory_space<vmem>>, vector<2x128xf32>,
      %cst_35 = arith.constant 0.000000e+00 : f32
      %42 = vector.broadcast %cst_35 : f32 to vector<2x128xf32>
      %c0_36 = arith.constant 0 : index
      %c0_37 = arith.constant 0 : index
      %43 = vector.load %arg9[%c0_36, %c0_37] : memref<2x128xf32, #tpu.memory_space<vmem>>, vector<2x128xf32>
      tpu.vector_store %arg9[%c0_36, %c0_37], %42 {strides = array<i32>} : memref<2x128xf32, #tpu.memory_space<vmem>>, vector<2x128xf32>,
      %cst_38 = arith.constant 0.000000e+00 : f32
      %44 = vector.broadcast %cst_38 : f32 to vector<2x128xf32>
      %c0_39 = arith.constant 0 : index
      %c0_40 = arith.constant 0 : index
      %45 = vector.load %arg10[%c0_39, %c0_40] : memref<2x128xf32, #tpu.memory_space<vmem>>, vector<2x128xf32>
      tpu.vector_store %arg10[%c0_39, %c0_40], %44 {strides = array<i32>} : memref<2x128xf32, #tpu.memory_space<vmem>>, vector<2x128xf32>,
      %cst_41 = arith.constant 0.000000e+00 : f32
      %46 = vector.broadcast %cst_41 : f32 to vector<2x128xf32>
      %c0_42 = arith.constant 0 : index
      %c0_43 = arith.constant 0 : index
      %47 = vector.load %arg11[%c0_42, %c0_43] : memref<2x128xf32, #tpu.memory_space<vmem>>, vector<2x128xf32>
      tpu.vector_store %arg11[%c0_42, %c0_43], %46 {strides = array<i32>} : memref<2x128xf32, #tpu.memory_space<vmem>>, vector<2x128xf32>,
    } else {
    }
    %c0 = arith.constant 0 : index
    %c0_1 = arith.constant 0 : index
    %c0_2 = arith.constant 0 : index
    %3 = vector.load %arg2[%c0, %c0_1, %c0_2] : memref<2x8x128xf32, #tpu.memory_space<vmem>>, vector<2x8x128xf32>
    %c0_3 = arith.constant 0 : index
    %c0_4 = arith.constant 0 : index
    %c0_5 = arith.constant 0 : index
    %4 = vector.load %arg3[%c0_3, %c0_4, %c0_5] : memref<2x8x128xf32, #tpu.memory_space<vmem>>, vector<2x8x128xf32>
    %5 = math.log %3 : vector<2x8x128xf32>
    %cst = arith.constant -1.000000e+02 : f32
    %6 = vector.broadcast %cst : f32 to vector<2x8x128xf32>
    %7 = arith.maximumf %5, %6 : vector<2x8x128xf32>
    %cst_6 = arith.constant 1.000000e+00 : f32
    %8 = vector.broadcast %cst_6 : f32 to vector<2x8x128xf32>
    %9 = arith.subf %8, %3 : vector<2x8x128xf32>
    %10 = math.log %9 : vector<2x8x128xf32>
    %cst_7 = arith.constant -1.000000e+02 : f32
    %11 = vector.broadcast %cst_7 : f32 to vector<2x8x128xf32>
    %12 = arith.maximumf %10, %11 : vector<2x8x128xf32>
    %13 = arith.mulf %4, %7 : vector<2x8x128xf32>
    %cst_8 = arith.constant 1.000000e+00 : f32
    %14 = vector.broadcast %cst_8 : f32 to vector<2x8x128xf32>
    %15 = arith.subf %14, %4 : vector<2x8x128xf32>
    %16 = arith.mulf %15, %12 : vector<2x8x128xf32>
    %17 = arith.addf %13, %16 : vector<2x8x128xf32>
    %cst_9 = arith.constant 0.000000e+00 : f32
    %18 = vector.broadcast %cst_9 : f32 to vector<2x8x128xf32>
    %19 = arith.subf %18, %17 : vector<2x8x128xf32>
    %c0_10 = arith.constant 0 : index
    %c0_11 = arith.constant 0 : index
    %20 = vector.load %arg8[%c0_10, %c0_11] : memref<2x128xf32, #tpu.memory_space<vmem>>, vector<2x128xf32>
    %cst_12 = arith.constant dense<0.000000e+00> : vector<2x128xf32>
    %21 = vector.multi_reduction <add>, %19, %cst_12 [1] : vector<2x8x128xf32> to vector<2x128xf32>
    %22 = arith.addf %20, %21 : vector<2x128xf32>
    %c0_13 = arith.constant 0 : index
    %c0_14 = arith.constant 0 : index
    %23 = vector.load %arg8[%c0_13, %c0_14] : memref<2x128xf32, #tpu.memory_space<vmem>>, vector<2x128xf32>
    tpu.vector_store %arg8[%c0_13, %c0_14], %22 {strides = array<i32>} : memref<2x128xf32, #tpu.memory_space<vmem>>, vector<2x128xf32>,
    %c0_15 = arith.constant 0 : index
    %c0_16 = arith.constant 0 : index
    %24 = vector.load %arg9[%c0_15, %c0_16] : memref<2x128xf32, #tpu.memory_space<vmem>>, vector<2x128xf32>
    %25 = arith.mulf %3, %4 : vector<2x8x128xf32>
    %cst_17 = arith.constant dense<0.000000e+00> : vector<2x128xf32>
    %26 = vector.multi_reduction <add>, %25, %cst_17 [1] : vector<2x8x128xf32> to vector<2x128xf32>
    %27 = arith.addf %24, %26 : vector<2x128xf32>
    %c0_18 = arith.constant 0 : index
    %c0_19 = arith.constant 0 : index
    %28 = vector.load %arg9[%c0_18, %c0_19] : memref<2x128xf32, #tpu.memory_space<vmem>>, vector<2x128xf32>
    tpu.vector_store %arg9[%c0_18, %c0_19], %27 {strides = array<i32>} : memref<2x128xf32, #tpu.memory_space<vmem>>, vector<2x128xf32>,
    %c0_20 = arith.constant 0 : index
    %c0_21 = arith.constant 0 : index
    %29 = vector.load %arg10[%c0_20, %c0_21] : memref<2x128xf32, #tpu.memory_space<vmem>>, vector<2x128xf32>
    %cst_22 = arith.constant dense<0.000000e+00> : vector<2x128xf32>
    %30 = vector.multi_reduction <add>, %3, %cst_22 [1] : vector<2x8x128xf32> to vector<2x128xf32>
    %31 = arith.addf %29, %30 : vector<2x128xf32>
    %c0_23 = arith.constant 0 : index
    %c0_24 = arith.constant 0 : index
    %32 = vector.load %arg10[%c0_23, %c0_24] : memref<2x128xf32, #tpu.memory_space<vmem>>, vector<2x128xf32>
    tpu.vector_store %arg10[%c0_23, %c0_24], %31 {strides = array<i32>} : memref<2x128xf32, #tpu.memory_space<vmem>>, vector<2x128xf32>,
    %c0_25 = arith.constant 0 : index
    %c0_26 = arith.constant 0 : index
    %33 = vector.load %arg11[%c0_25, %c0_26] : memref<2x128xf32, #tpu.memory_space<vmem>>, vector<2x128xf32>
    %cst_27 = arith.constant dense<0.000000e+00> : vector<2x128xf32>
    %34 = vector.multi_reduction <add>, %4, %cst_27 [1] : vector<2x8x128xf32> to vector<2x128xf32>
    %35 = arith.addf %33, %34 : vector<2x128xf32>
    %c0_28 = arith.constant 0 : index
    %c0_29 = arith.constant 0 : index
    %36 = vector.load %arg11[%c0_28, %c0_29] : memref<2x128xf32, #tpu.memory_space<vmem>>, vector<2x128xf32>
    tpu.vector_store %arg11[%c0_28, %c0_29], %35 {strides = array<i32>} : memref<2x128xf32, #tpu.memory_space<vmem>>, vector<2x128xf32>,
    %c0_i32_30 = arith.constant 0 : i32
    %37 = arith.cmpi eq, %arg1, %c0_i32_30 : i32
    %38 = arith.extui %37 : i1 to i32
    %c0_i32_31 = arith.constant 0 : i32
    %39 = arith.cmpi ne, %38, %c0_i32_31 : i32
    scf.if %39 {
      %c0_32 = arith.constant 0 : index
      %c0_33 = arith.constant 0 : index
      %40 = vector.load %arg8[%c0_32, %c0_33] : memref<2x128xf32, #tpu.memory_space<vmem>>, vector<2x128xf32>
      %41 = vector.shape_cast %40 : vector<2x128xf32> to vector<1x2x128xf32>
      %c0_34 = arith.constant 0 : index
      %c0_35 = arith.constant 0 : index
      %c0_36 = arith.constant 0 : index
      %42 = vector.load %arg4[%c0_34, %c0_35, %c0_36] : memref<1x2x128xf32, #tpu.memory_space<vmem>>, vector<1x2x128xf32>
      tpu.vector_store %arg4[%c0_34, %c0_35, %c0_36], %41 {strides = array<i32>} : memref<1x2x128xf32, #tpu.memory_space<vmem>>, vector<1x2x128xf32>,
      %c0_37 = arith.constant 0 : index
      %c0_38 = arith.constant 0 : index
      %43 = vector.load %arg9[%c0_37, %c0_38] : memref<2x128xf32, #tpu.memory_space<vmem>>, vector<2x128xf32>
      %44 = vector.shape_cast %43 : vector<2x128xf32> to vector<1x2x128xf32>
      %c0_39 = arith.constant 0 : index
      %c0_40 = arith.constant 0 : index
      %c0_41 = arith.constant 0 : index
      %45 = vector.load %arg5[%c0_39, %c0_40, %c0_41] : memref<1x2x128xf32, #tpu.memory_space<vmem>>, vector<1x2x128xf32>
      tpu.vector_store %arg5[%c0_39, %c0_40, %c0_41], %44 {strides = array<i32>} : memref<1x2x128xf32, #tpu.memory_space<vmem>>, vector<1x2x128xf32>,
      %c0_42 = arith.constant 0 : index
      %c0_43 = arith.constant 0 : index
      %46 = vector.load %arg10[%c0_42, %c0_43] : memref<2x128xf32, #tpu.memory_space<vmem>>, vector<2x128xf32>
      %47 = vector.shape_cast %46 : vector<2x128xf32> to vector<1x2x128xf32>
      %c0_44 = arith.constant 0 : index
      %c0_45 = arith.constant 0 : index
      %c0_46 = arith.constant 0 : index
      %48 = vector.load %arg6[%c0_44, %c0_45, %c0_46] : memref<1x2x128xf32, #tpu.memory_space<vmem>>, vector<1x2x128xf32>
      tpu.vector_store %arg6[%c0_44, %c0_45, %c0_46], %47 {strides = array<i32>} : memref<1x2x128xf32, #tpu.memory_space<vmem>>, vector<1x2x128xf32>,
      %c0_47 = arith.constant 0 : index
      %c0_48 = arith.constant 0 : index
      %49 = vector.load %arg11[%c0_47, %c0_48] : memref<2x128xf32, #tpu.memory_space<vmem>>, vector<2x128xf32>
      %50 = vector.shape_cast %49 : vector<2x128xf32> to vector<1x2x128xf32>
      %c0_49 = arith.constant 0 : index
      %c0_50 = arith.constant 0 : index
      %c0_51 = arith.constant 0 : index
      %51 = vector.load %arg7[%c0_49, %c0_50, %c0_51] : memref<1x2x128xf32, #tpu.memory_space<vmem>>, vector<1x2x128xf32>
      tpu.vector_store %arg7[%c0_49, %c0_50, %c0_51], %50 {strides = array<i32>} : memref<1x2x128xf32, #tpu.memory_space<vmem>>, vector<1x2x128xf32>,
    } else {
    }
    return
  }
  func.func @transform_0(%arg0: i32, %arg1: i32) -> (i32, i32, i32) {
    %c1_i32 = arith.constant 1 : i32
    %0 = arith.muli %arg0, %c1_i32 : i32
    %1 = arith.addi %0, %arg1 : i32
    %c0_i32 = arith.constant 0 : i32
    %c0_i32_0 = arith.constant 0 : i32
    %c0_i32_1 = arith.constant 0 : i32
    return %c0_i32, %1, %c0_i32_0 : i32, i32, i32
  }
  func.func @transform_1(%arg0: i32, %arg1: i32) -> (i32, i32, i32) {
    %c1_i32 = arith.constant 1 : i32
    %0 = arith.muli %arg0, %c1_i32 : i32
    %1 = arith.addi %0, %arg1 : i32
    %c0_i32 = arith.constant 0 : i32
    %c0_i32_0 = arith.constant 0 : i32
    %c0_i32_1 = arith.constant 0 : i32
    return %c0_i32, %1, %c0_i32_0 : i32, i32, i32
  }
  func.func @transform_2(%arg0: i32, %arg1: i32) -> (i32, i32, i32) {
    %c0_i32 = arith.constant 0 : i32
    %c0_i32_0 = arith.constant 0 : i32
    %c0_i32_1 = arith.constant 0 : i32
    return %arg0, %c0_i32, %c0_i32_0 : i32, i32, i32
  }
  func.func @transform_3(%arg0: i32, %arg1: i32) -> (i32, i32, i32) {
    %c0_i32 = arith.constant 0 : i32
    %c0_i32_0 = arith.constant 0 : i32
    %c0_i32_1 = arith.constant 0 : i32
    return %arg0, %c0_i32, %c0_i32_0 : i32, i32, i32
  }
  func.func @transform_4(%arg0: i32, %arg1: i32) -> (i32, i32, i32) {
    %c0_i32 = arith.constant 0 : i32
    %c0_i32_0 = arith.constant 0 : i32
    %c0_i32_1 = arith.constant 0 : i32
    return %arg0, %c0_i32, %c0_i32_0 : i32, i32, i32
  }
  func.func @transform_5(%arg0: i32, %arg1: i32) -> (i32, i32, i32) {
    %c0_i32 = arith.constant 0 : i32
    %c0_i32_0 = arith.constant 0 : i32
    %c0_i32_1 = arith.constant 0 : i32
    return %arg0, %c0_i32, %c0_i32_0 : i32, i32, i32
  }
}

</mosaic_0001>

<bundles_post_ra>
// kernel: tpu_custom_call.1
= control target key start
LH: loop header
LB: loop body
LE: loop exit
PB: predicated region body
PF: predicated region fallthrough
CT: control target
= control target key end

     0   :  { %11 = vsyncpa [#allocation7], 0  ;;  %s459_s0 = inlined_call_operand.hbm [shape: f32[2,8,128], index: 0, kind: input, shape index: {}]   ;;  %s460_s1 = inlined_call_operand.hbm [shape: f32[2,8,128], index: 1, kind: input, shape index: {}]   ;;  %s461_s2 = inlined_call_operand.hbm [shape: f32[1,2,128], index: 2, kind: output, shape index: {0}]   ;;  %s462_s3 = inlined_call_operand.hbm [shape: f32[1,2,128], index: 3, kind: output, shape index: {1}]   ;;  %s463_s4 = inlined_call_operand.hbm [shape: f32[1,2,128], index: 4, kind: output, shape index: {2}]   ;;  %s464_s5 = inlined_call_operand.hbm [shape: f32[1,2,128], index: 5, kind: output, shape index: {3}]  }
   0x1   :  { %12 = vsyncpa [#allocation10], 0 }
   0x2   :  { %13 = vsyncpa [#allocation8], 0 }
   0x3   :  { %14 = vsyncpa [#allocation13], 0 }
   0x4   :  { %15 = vsyncpa [#allocation16], 0  ;;  %s384_s18 = smov [#allocation6]  }
   0x5   :  { %s24_s19 = sshll.u32 %s384_s18, 4  ;;  %s25_s19 = int_to_ptr.vmem [resolvable:$true] %s24_s19 }
   0x6   :  { %s262_s20 = scalar_lea.vmem %s25_s19, 256  ;;  %p267_p1 = scmp.lt.s32.totalorder %s25_s19, %s25_s19 }
   0x7   :  { %p263_p0 = scmp.ne.s32.totalorder %s25_s19, %s262_s20  ;;  %p268_p2 = scmp.lt.s32.totalorder %s262_s20, %s262_s20 }
   0x9   :  { %p269_p3 = por %p268_p2, %p267_p1 }
   0xb   :  { %p270_p4 = pnand %p269_p3, %p263_p0 }
   0xd   :  { %273 = shalt.err (!%p270_p4)
}
   0xe   :  { %s385_s21 = smov 128   ;;  %s386_s22 = smov 8  }
   0xf   :  { %30 = dma.hbm_to_vmem [thread:$0]  %s459_s0, 256, %s25_s19, [#allocation7], %s385_s21, %s385_s21, %s386_s22  }
  0x10   :  { %s387_s25 = smov [#allocation9]  }
  0x11   :  { %s39_s26 = sshll.u32 %s387_s25, 4  ;;  %s40_s26 = int_to_ptr.vmem [resolvable:$true] %s39_s26 }
  0x12   :  { %s282_s27 = scalar_lea.vmem %s40_s26, 256  ;;  %p287_p6 = scmp.lt.s32.totalorder %s40_s26, %s40_s26 }
  0x13   :  { %p283_p5 = scmp.ne.s32.totalorder %s40_s26, %s282_s27  ;;  %p288_p7 = scmp.lt.s32.totalorder %s282_s27, %s282_s27 }
  0x15   :  { %p289_p8 = por %p288_p7, %p287_p6 }
  0x17   :  { %p290_p9 = pnand %p289_p8, %p283_p5 }
  0x19   :  { %293 = shalt.err (!%p290_p9)
}
  0x1a   :  { %45 = dma.hbm_to_vmem [thread:$0]  %s460_s1, 256, %s40_s26, [#allocation10], %s385_s21, %s385_s21, %s386_s22  }
  0x1b   :  { %374 = dma.done.wait [#allocation7], 256  }
  0x1c   :  { %375 = vsyncadd [#allocation7], 4294967040 }
  0x1d   :  { %376 = dma.done.wait [#allocation10], 256  }
  0x1e   :  { %377 = vsyncadd [#allocation10], 4294967040  ;;  %v388_v0 = vmov 0.0   ;;  %v62_v1 = vld [vmem:[#allocation6] sm:$0xff]  ;;  %v63_v2 = vld [vmem:[#allocation6 + $0x8] sm:$0xff]  ;;  %vm105_vm0 = vcmask 1041409  }
  0x1f   :  { %59 = vst [vmem:[#allocation3] sm:$0x3] %v388_v0  ;;  %58 = vst [vmem:[#allocation2] sm:$0x3] %v388_v0  ;;  %v429_v3 = vld [vmem:[#allocation9] sm:$0xff]  ;;  %v431_v4 = vld [vmem:[#allocation9 + $0x8] sm:$0xff]  ;;  %246 = vlog2.f32 %v62_v1 }
  0x20   :  { %60 = vst [vmem:[#allocation4] sm:$0x3] %v388_v0  ;;  %61 = vst [vmem:[#allocation5] sm:$0x3] %v388_v0  ;;  %v111_v5 = vmul.f32 %v429_v3, %v62_v1  ;;  %v72_v6 = vsub.f32 1.0, %v62_v1  ;;  %v73_v7 = vsub.f32 1.0, %v63_v2  ;;  %v112_v8 = vmul.f32 %v431_v4, %v63_v2 }
  0x21   :  { %248 = vlog2.f32 %v63_v2  ;;  %v132_v10 = vrot.slane %v62_v1, 4  ;;  %v138_v11 = vrot.slane %v63_v2, 4  ;;  %v151_v13 = vrot.slane %v429_v3, 4  ;;  %s389_s0 = smov [#allocation12]   ;;  %s390_s30 = smov [#allocation14]  }
  0x22   :  { %v113_v9 = vrot.slane %v111_v5, 4  ;;  %250 = vlog2.f32 %v72_v6  ;;  %v119_v12 = vrot.slane %v112_v8, 4  ;;  %v157_v14 = vrot.slane %v431_v4, 4  ;;  %s196_s1 = sshll.u32 %s389_s0, 4  ;;  %s206_s6 = sshll.u32 %s390_s30, 4  ;;  %s197_s1 = int_to_ptr.vmem [resolvable:$true] %s196_s1  ;;  %s207_s6 = int_to_ptr.vmem [resolvable:$true] %s206_s6 }
  0x23   :  { %252 = vlog2.f32 %v73_v7  ;;  %v133_v16 = vadd.f32 %v132_v10, %v62_v1  ;;  %v139_v17 = vadd.f32 %v138_v11, %v63_v2  ;;  %v152_v19 = vadd.f32 %v151_v13, %v429_v3  ;;  %s391_s7 = smov [#allocation15]   ;;  %s294_s9 = scalar_lea.vmem %s197_s1, 32 }
  0x24   :  { %v114_v15 = vadd.f32 %v113_v9, %v111_v5  ;;  %v120_v18 = vadd.f32 %v119_v12, %v112_v8  ;;  %v158_v20 = vadd.f32 %v157_v14, %v431_v4  ;;  %v82_v51 = vsub.f32 1.0, %v429_v3  ;;  %s216_s8 = sshll.u32 %s391_s7, 4  ;;  %p295_p10 = scmp.ne.s32.totalorder %s197_s1, %s294_s9  ;;  %s217_s8 = int_to_ptr.vmem [resolvable:$true] %s216_s8 }
  0x25   :  { %v134_v22 = vrot.slane %v133_v16, 2  ;;  %v140_v23 = vrot.slane %v139_v17, 2  ;;  %v153_v25 = vrot.slane %v152_v19, 2  ;;  %v83_v1 = vsub.f32 1.0, %v431_v4  ;;  %p299_p11 = scmp.lt.s32.totalorder %s197_s1, %s197_s1  ;;  %p300_p12 = scmp.lt.s32.totalorder %s294_s9, %s294_s9 }
  0x26   :  { %v115_v21 = vrot.slane %v114_v15, 2  ;;  %v121_v24 = vrot.slane %v120_v18, 2  ;;  %v159_v26 = vrot.slane %v158_v20, 2  ;;  %v110_v44 = vld [vmem:[#allocation3] sm:$0x3] }
  0x27   :  { %v135_v28 = vadd.f32 %v134_v22, %v133_v16  ;;  %v141_v29 = vadd.f32 %v140_v23, %v139_v17  ;;  %v154_v31 = vadd.f32 %v153_v25, %v152_v19  ;;  %v131_v40 = vld [vmem:[#allocation4] sm:$0x3]  ;;  %v150_v46 = vld [vmem:[#allocation5] sm:$0x3]  ;;  %p301_p13 = por %p300_p12, %p299_p11 }
  0x28   :  { %v116_v27 = vadd.f32 %v115_v21, %v114_v15  ;;  %v122_v30 = vadd.f32 %v121_v24, %v120_v18  ;;  %v160_v32 = vadd.f32 %v159_v26, %v158_v20 }
  0x29   :  { %v136_v34 = vrot.slane %v135_v28, 1  ;;  %v142_v35 = vrot.slane %v141_v29, 1  ;;  %v155_v37 = vrot.slane %v154_v31, 1  ;;  %p302_p0 = pnand %p301_p13, %p295_p10 }
  0x2a   :  { %v117_v33 = vrot.slane %v116_v27, 1  ;;  %v123_v36 = vrot.slane %v122_v30, 1  ;;  %v161_v38 = vrot.slane %v160_v32, 1 }
  0x2b   :  { %v137_v41 = vadd.f32 %v136_v34, %v135_v28  ;;  %v143_v42 = vadd.f32 %v142_v35, %v141_v29  ;;  %v156_v47 = vadd.f32 %v155_v37, %v154_v31 }
  0x2c   :  { %v118_v39 = vadd.f32 %v117_v33, %v116_v27  ;;  %v247_v43 = vpop.eup %246  ;;  %v124_v45 = vadd.f32 %v123_v36, %v122_v30  ;;  %v162_v48 = vadd.f32 %v161_v38, %v160_v32 }
  0x2d   :  { %v67_v50 = vmul.f32 0.6931472, %v247_v43  ;;  %v146_v52 = vsel %vm105_vm0, %v143_v42, %v137_v41 }
  0x2e   :  { %v249_v49 = vpop.eup %248  ;;  %v127_v54 = vsel %vm105_vm0, %v124_v45, %v118_v39  ;;  %v148_v56 = vadd.f32 %v146_v52, %v131_v40  ;;  %v165_v57 = vsel %vm105_vm0, %v162_v48, %v156_v47 }
  0x2f   :  { %v251_v53 = vpop.eup %250  ;;  %v69_v55 = vmul.f32 0.6931472, %v249_v49  ;;  %v129_v59 = vadd.f32 %v127_v54, %v110_v44  ;;  %v70_v60 = vmax.f32 %v67_v50, -100.0  ;;  %v167_v62 = vadd.f32 %v165_v57, %v150_v46 }
  0x30   :  { %v253_v58 = vpop.eup %252  ;;  %v75_v61 = vmul.f32 0.6931472, %v251_v53  ;;  %149 = vst [vmem:[#allocation4] sm:$0x3] %v148_v56 }
  0x31   :  { %v71_v63 = vmax.f32 %v69_v55, -100.0  ;;  %v77_v0 = vmul.f32 0.6931472, %v253_v58  ;;  %130 = vst [vmem:[#allocation3] sm:$0x3] %v129_v59  ;;  %v80_v5 = vmul.f32 %v70_v60, %v429_v3 }
  0x32   :  { %v78_v2 = vmax.f32 %v75_v61, -100.0  ;;  %168 = vst [vmem:[#allocation5] sm:$0x3] %v167_v62 }
  0x33   :  { %v79_v6 = vmax.f32 %v77_v0, -100.0  ;;  %v81_v7 = vmul.f32 %v71_v63, %v431_v4 }
  0x34   :  { %v84_v8 = vmul.f32 %v82_v51, %v78_v2 }
  0x35   :  { %v85_v9 = vmul.f32 %v83_v1, %v79_v6 }
  0x36   :  { %v86_v10 = vadd.f32 %v84_v8, %v80_v5 }
  0x37   :  { %v87_v11 = vadd.f32 %v85_v9, %v81_v7  ;;  %v176_v13 = vld [vmem:[#allocation4] sm:$0x3] }
  0x38   :  { %v88_v12 = vsub.f32 0.0, %v86_v10  ;;  %v174_v15 = vld [vmem:[#allocation3] sm:$0x3]  ;;  %177 = vst [vmem:[#allocation14] sm:$0x3] %v176_v13 }
  0x39   :  { %v89_v14 = vsub.f32 0.0, %v87_v11  ;;  %v178_v3 = vld [vmem:[#allocation5] sm:$0x3]  ;;  %175 = vst [vmem:[#allocation12] sm:$0x3] %v174_v15 }
  0x3a   :  { %v91_v16 = vrot.slane %v88_v12, 4  ;;  %179 = vst [vmem:[#allocation15] sm:$0x3] %v178_v3 }
  0x3b   :  { %v97_v4 = vrot.slane %v89_v14, 4 }
  0x3c   :  { %305 = shalt.err (!%p302_p0)
}
  0x3d   :  { %199 = dma.vmem_to_hbm [thread:$0]  %s197_s1, 32, %s462_s3, [#allocation13]   ;;  %v92_v17 = vadd.f32 %v91_v16, %v88_v12 }
  0x3e   :  { %s314_s12 = scalar_lea.vmem %s207_s6, 32  ;;  %p319_p2 = scmp.lt.s32.totalorder %s207_s6, %s207_s6 }
  0x3f   :  { %p315_p1 = scmp.ne.s32.totalorder %s207_s6, %s314_s12  ;;  %p320_p3 = scmp.lt.s32.totalorder %s314_s12, %s314_s12 }
  0x41   :  { %p321_p4 = por %p320_p3, %p319_p2 }
  0x43   :  { %p322_p5 = pnand %p321_p4, %p315_p1 }
  0x45   :  { %325 = shalt.err (!%p322_p5)
}
  0x46   :  { %209 = dma.vmem_to_hbm [thread:$0]  %s207_s6, 32, %s463_s4, [#allocation13]   ;;  %v98_v18 = vadd.f32 %v97_v4, %v89_v14 }
  0x47   :  { %s334_s15 = scalar_lea.vmem %s217_s8, 32  ;;  %p339_p7 = scmp.lt.s32.totalorder %s217_s8, %s217_s8 }
  0x48   :  { %p335_p6 = scmp.ne.s32.totalorder %s217_s8, %s334_s15  ;;  %p340_p8 = scmp.lt.s32.totalorder %s334_s15, %s334_s15 }
  0x4a   :  { %p341_p9 = por %p340_p8, %p339_p7 }
  0x4c   :  { %p342_p10 = pnand %p341_p9, %p335_p6 }
  0x4e   :  { %345 = shalt.err (!%p342_p10)
}
  0x4f   :  { %219 = dma.vmem_to_hbm [thread:$0]  %s217_s8, 32, %s464_s5, [#allocation16]   ;;  %v93_v19 = vrot.slane %v92_v17, 2  ;;  %v99_v20 = vrot.slane %v98_v18, 2  ;;  %v90_v26 = vld [vmem:[#allocation2] sm:$0x3] }
  0x50   :  { %s392_s4 = smov [#allocation11]  }
  0x51   :  { %v94_v21 = vadd.f32 %v93_v19, %v92_v17  ;;  %v100_v22 = vadd.f32 %v99_v20, %v98_v18  ;;  %s186_s17 = sshll.u32 %s392_s4, 4  ;;  %s187_s17 = int_to_ptr.vmem [resolvable:$true] %s186_s17 }
  0x52   :  { %s354_s18 = scalar_lea.vmem %s187_s17, 32  ;;  %p359_p12 = scmp.lt.s32.totalorder %s187_s17, %s187_s17 }
  0x53   :  { %v95_v23 = vrot.slane %v94_v21, 1  ;;  %v101_v24 = vrot.slane %v100_v22, 1  ;;  %p355_p11 = scmp.ne.s32.totalorder %s187_s17, %s354_s18  ;;  %p360_p13 = scmp.lt.s32.totalorder %s354_s18, %s354_s18 }
  0x55   :  { %v96_v25 = vadd.f32 %v95_v23, %v94_v21  ;;  %v102_v27 = vadd.f32 %v101_v24, %v100_v22  ;;  %p361_p0 = por %p360_p13, %p359_p12 }
  0x57   :  { %v106_v28 = vsel %vm105_vm0, %v102_v27, %v96_v25  ;;  %p362_p1 = pnand %p361_p0, %p355_p11 }
  0x58   :  { %v108_v29 = vadd.f32 %v106_v28, %v90_v26 }
  0x5a   :  { %109 = vst [vmem:[#allocation2] sm:$0x3] %v108_v29 }
  0x61   :  { %v172_v30 = vld [vmem:[#allocation2] sm:$0x3] }
  0x62   :  { %173 = vst [vmem:[#allocation11] sm:$0x3] %v172_v30 }
  0x63   :  { %365 = shalt.err (!%p362_p1)
}
  0x64   :  { %189 = dma.vmem_to_hbm [thread:$0]  %s187_s17, 32, %s461_s2, [#allocation8]  }
  0x65   :  { %378 = dma.done.wait [#allocation8], 32  }
  0x66   :  { %379 = vsyncadd [#allocation8], 4294967264 }
  0x67   :  { %380 = dma.done.wait [#allocation13], 64  }
  0x68   :  { %381 = vsyncadd [#allocation13], 4294967232 }
  0x69   :  { %382 = dma.done.wait [#allocation16], 32  }
  0x6a   :  { %383 = vsyncadd [#allocation16], 4294967264 }
  0x6b   :  { %232 = vsyncpa [#allocation7], 1 }
  0x6c   :  { %233 = vsyncpa [#allocation10], 1 }
  0x6d   :  { %234 = vsyncpa [#allocation8], 1 }
  0x6e   :  { %235 = vsyncpa [#allocation13], 1 }
  0x6f   :  { %236 = vsyncpa [#allocation16], 1 }

</bundles_post_ra>
